<compile_context>
chip_gen: v5e
topology: v5e:2x2
jax: 0.10.0
libtpu: 0.0.40
codegen_flags: <defaults>
</compile_context>

<pallas_src>
import jax
import jax.numpy as jnp
from jax.experimental import pallas as pl
from jax.experimental.pallas import tpu as pltpu


def actor_kernel(x_ref, w0_ref, b0_ref, w1_ref, b1_ref, w2_ref, b2_ref, o_ref):
    """Fused MLP forward: relu(x@W0+b0) -> relu(.@W1+b1) -> tanh(.@W2+b2)."""
    # Cast activations to bf16 in-kernel (weights are pre-cast bf16; biases f32).
    x = x_ref[...].astype(jnp.bfloat16)  # (block_b, in_dim)
    # Layer 0: bf16 x bf16 -> f32 accumulate, bias+ReLU in f32, recast for MXU.
    h0 = jnp.dot(x, w0_ref[...], preferred_element_type=jnp.float32) + b0_ref[...]
    h0 = jnp.maximum(h0, 0.0).astype(jnp.bfloat16)
    # Layer 1.
    h1 = jnp.dot(h0, w1_ref[...], preferred_element_type=jnp.float32) + b1_ref[...]
    h1 = jnp.maximum(h1, 0.0).astype(jnp.bfloat16)
    # Layer 2: tanh in f32, true-width store (out_dim == full array last dim).
    h2 = jnp.dot(h1, w2_ref[...], preferred_element_type=jnp.float32) + b2_ref[...]
    o_ref[...] = jnp.tanh(h2).astype(o_ref.dtype)


def prepare_actor_params(params):
    """One-time preprocessing: cast weights to bf16 (biases stay f32)."""
    w0, b0, w1, b1, w2, b2 = params
    return (
        w0.astype(jnp.bfloat16), b0.astype(jnp.float32),
        w1.astype(jnp.bfloat16), b1.astype(jnp.float32),
        w2.astype(jnp.bfloat16), b2.astype(jnp.float32),
    )


def _vmem_estimate_bytes(block_b, in_dim, h0_dim, h1_dim, out_dim):
    """Rough VMEM need: double-buffered I/O tiles + weights + intermediates."""
    bytes_in = 2 * block_b * in_dim * 4          # f32 x tile, double-buffered
    bytes_out = 2 * block_b * out_dim * 4        # f32 out tile, double-buffered
    bytes_w = 2 * 2 * (in_dim * h0_dim + h0_dim * h1_dim + h1_dim * out_dim)
    bytes_b = 2 * 4 * (h0_dim + h1_dim + out_dim)
    bytes_mid = block_b * (h0_dim + h1_dim) * (4 + 2)  # f32 + bf16 intermediates
    total = bytes_in + bytes_out + bytes_w + bytes_b + bytes_mid
    # 2x headroom, clamp to [8 MiB, 64 MiB].
    return int(min(64 * 1024 * 1024, max(8 * 1024 * 1024, 2 * total)))


def actor_forward(x, prepared_params, *, block_b=None):
    """Runs the fused Actor forward pass.

    x: (B, input_size) float32.
    prepared_params: output of prepare_actor_params().
    """
    w0, b0, w1, b1, w2, b2 = prepared_params
    B, in_dim = x.shape
    h0_dim = w0.shape[1]
    h1_dim = w1.shape[1]
    out_dim = w2.shape[1]

    # ---- batch tile selection: one big tile up to block_b rows ----
    if block_b is None:
        block_b = 1024
    # sublane-multiple tile, never bigger than the (rounded-up) batch
    block_b = max(8, min(block_b, ((B + 7) // 8) * 8))

    n_tiles = pl.cdiv(B, block_b)
    B_pad = n_tiles * block_b

    # ---- pad batch to a whole number of tiles (only if needed) ----
    xp = x
    if B_pad != B:
        xp = jnp.zeros((B_pad, in_dim), x.dtype).at[:B].set(x)

    # Weights/biases are whole-array blocks with constant (0,0) index maps so
    # they stay VMEM-resident across grid steps.
    full = lambda r, c: pl.BlockSpec((r, c), lambda i: (0, 0))

    out = pl.pallas_call(
        actor_kernel,
        out_shape=jax.ShapeDtypeStruct((B_pad, out_dim), jnp.float32),
        grid_spec=pl.GridSpec(
            grid=(n_tiles,),
            in_specs=[
                pl.BlockSpec((block_b, in_dim), lambda i: (i, 0)),  # x tile (f32)
                full(in_dim, h0_dim),    # w0 (bf16)
                full(1, h0_dim),         # b0 (f32)
                full(h0_dim, h1_dim),    # w1 (bf16)
                full(1, h1_dim),         # b1 (f32)
                full(h1_dim, out_dim),   # w2 (bf16, true width)
                full(1, out_dim),        # b2 (f32, true width)
            ],
            out_specs=pl.BlockSpec((block_b, out_dim), lambda i: (i, 0)),
        ),
        compiler_params=pltpu.CompilerParams(
            dimension_semantics=("parallel",),
            vmem_limit_bytes=_vmem_estimate_bytes(
                block_b, in_dim, h0_dim, h1_dim, out_dim),
        ),
    )(xp, w0, b0, w1, b1, w2, b2)

    if B_pad != B:
        out = out[:B]
    return out


def init_actor_params(key, input_size, output_size):
    """Deterministic PyTorch-style (uniform +/- 1/sqrt(fan_in)) init."""
    dims = [
        (input_size, input_size * 2),
        (input_size * 2, input_size * 5),
        (input_size * 5, output_size),
    ]
    params = []
    for (fan_in, fan_out) in dims:
        key, kw, kb = jax.random.split(key, 3)
        bound = 1.0 / jnp.sqrt(jnp.float32(fan_in))
        w = jax.random.uniform(kw, (fan_in, fan_out), jnp.float32, -bound, bound)
        b = jax.random.uniform(kb, (1, fan_out), jnp.float32, -bound, bound)
        params += [w, b]
    return tuple(params)


def actor_reference(x, params):
    w0, b0, w1, b1, w2, b2 = params
    h0 = jax.nn.relu(x @ w0 + b0)
    h1 = jax.nn.relu(h0 @ w1 + b1)
    return jnp.tanh(h1 @ w2 + b2)


if __name__ == "__main__":
    input_size = 32
    output_size = 8

    key = jax.random.PRNGKey(0)
    key, kx1, kx2 = jax.random.split(key, 3)
    params = init_actor_params(key, input_size, output_size)
    prepared = prepare_actor_params(params)   # one-time bf16 cast of weights

    # Case 1: batch fits a single tile (single grid step, no padding).
    x1 = jax.random.normal(kx1, (48, input_size), jnp.float32)
    out1 = jax.block_until_ready(actor_forward(x1, prepared))
    ref1 = actor_reference(x1, params)
    assert out1.shape == ref1.shape
    # bf16 MXU operands -> loosened tolerance vs the f32 reference.
    assert jnp.allclose(out1, ref1, atol=3e-2, rtol=0.0), "mismatch vs reference (case 1)"

    # Case 2: batch not a multiple of the sublane tile (exercises wrapper-side padding).
    x2 = jax.random.normal(kx2, (10, input_size), jnp.float32)
    out2 = jax.block_until_ready(actor_forward(x2, prepared))
    ref2 = actor_reference(x2, params)
    assert out2.shape == ref2.shape
    assert jnp.allclose(out2, ref2, atol=3e-2, rtol=0.0), "mismatch vs reference (case 2)"

    # Case 3: multi-tile large batch (exercises the parallel grid / megacore path).
    key, kx3 = jax.random.split(key)
    x3 = jax.random.normal(kx3, (2048 + 24, input_size), jnp.float32)
    out3 = jax.block_until_ready(actor_forward(x3, prepared, block_b=1024))
    ref3 = actor_reference(x3, params)
    assert out3.shape == ref3.shape
    assert jnp.allclose(out3, ref3, atol=3e-2, rtol=0.0), "mismatch vs reference (case 3)"

    print("KERNEL_OK")
</pallas_src>

<mosaic_0001>
module attributes {stable_mosaic.version = 11 : i64} {
  func.func @actor_kernel(%arg0: i32, %arg1: memref<48x32xf32, #tpu.memory_space<vmem>>, %arg2: memref<32x64xbf16, #tpu.memory_space<vmem>>, %arg3: memref<1x64xf32, #tpu.memory_space<vmem>>, %arg4: memref<64x160xbf16, #tpu.memory_space<vmem>>, %arg5: memref<1x160xf32, #tpu.memory_space<vmem>>, %arg6: memref<160x8xbf16, #tpu.memory_space<vmem>>, %arg7: memref<1x8xf32, #tpu.memory_space<vmem>>, %arg8: memref<48x8xf32, #tpu.memory_space<vmem>>) attributes {dimension_semantics = [#tpu.dimension_semantics<parallel>], iteration_bounds = array<i64: 1>, scalar_prefetch = 0 : i64, scratch_operands = 0 : i64, tpu.core_type = #tpu.core_type<tc>, window_params = [{transform_indices = @transform_0, window_bounds = array<i64: 48, 32>}, {pipeline_mode = #tpu.pipeline_mode<synchronous>, transform_indices = @transform_1, window_bounds = array<i64: 32, 64>}, {pipeline_mode = #tpu.pipeline_mode<synchronous>, transform_indices = @transform_2, window_bounds = array<i64: 1, 64>}, {pipeline_mode = #tpu.pipeline_mode<synchronous>, transform_indices = @transform_3, window_bounds = array<i64: 64, 160>}, {pipeline_mode = #tpu.pipeline_mode<synchronous>, transform_indices = @transform_4, window_bounds = array<i64: 1, 160>}, {pipeline_mode = #tpu.pipeline_mode<synchronous>, transform_indices = @transform_5, window_bounds = array<i64: 160, 8>}, {pipeline_mode = #tpu.pipeline_mode<synchronous>, transform_indices = @transform_6, window_bounds = array<i64: 1, 8>}, {transform_indices = @transform_7, window_bounds = array<i64: 48, 8>}]} {
    %c0 = arith.constant 0 : index
    %c0_0 = arith.constant 0 : index
    %0 = vector.load %arg1[%c0, %c0_0] : memref<48x32xf32, #tpu.memory_space<vmem>>, vector<48x32xf32>
    %1 = arith.truncf %0 : vector<48x32xf32> to vector<48x32xbf16>
    %c0_1 = arith.constant 0 : index
    %c0_2 = arith.constant 0 : index
    %2 = vector.load %arg2[%c0_1, %c0_2] : memref<32x64xbf16, #tpu.memory_space<vmem>>, vector<32x64xbf16>
    %cst = arith.constant dense<0.000000e+00> : vector<48x64xf32>
    %3 = tpu.matmul %1, %2, %cst {dimension_numbers = #tpu.dot_dimension_numbers<[1], [0], [0], [1], [0, 0, 1, 1], [], []>} : vector<48x32xbf16>, vector<32x64xbf16>, vector<48x64xf32> -> vector<48x64xf32>
    %c0_3 = arith.constant 0 : index
    %c0_4 = arith.constant 0 : index
    %4 = vector.load %arg3[%c0_3, %c0_4] : memref<1x64xf32, #tpu.memory_space<vmem>>, vector<1x64xf32>
    %5 = vector.broadcast %4 : vector<1x64xf32> to vector<48x64xf32>
    %6 = arith.addf %3, %5 : vector<48x64xf32>
    %cst_5 = arith.constant 0.000000e+00 : f32
    %7 = vector.broadcast %cst_5 : f32 to vector<48x64xf32>
    %8 = arith.maximumf %6, %7 : vector<48x64xf32>
    %9 = arith.truncf %8 : vector<48x64xf32> to vector<48x64xbf16>
    %c0_6 = arith.constant 0 : index
    %c0_7 = arith.constant 0 : index
    %10 = vector.load %arg4[%c0_6, %c0_7] : memref<64x160xbf16, #tpu.memory_space<vmem>>, vector<64x160xbf16>
    %cst_8 = arith.constant dense<0.000000e+00> : vector<48x160xf32>
    %11 = tpu.matmul %9, %10, %cst_8 {dimension_numbers = #tpu.dot_dimension_numbers<[1], [0], [0], [1], [0, 0, 1, 1], [], []>} : vector<48x64xbf16>, vector<64x160xbf16>, vector<48x160xf32> -> vector<48x160xf32>
    %c0_9 = arith.constant 0 : index
    %c0_10 = arith.constant 0 : index
    %12 = vector.load %arg5[%c0_9, %c0_10] : memref<1x160xf32, #tpu.memory_space<vmem>>, vector<1x160xf32>
    %13 = vector.broadcast %12 : vector<1x160xf32> to vector<48x160xf32>
    %14 = arith.addf %11, %13 : vector<48x160xf32>
    %cst_11 = arith.constant 0.000000e+00 : f32
    %15 = vector.broadcast %cst_11 : f32 to vector<48x160xf32>
    %16 = arith.maximumf %14, %15 : vector<48x160xf32>
    %17 = arith.truncf %16 : vector<48x160xf32> to vector<48x160xbf16>
    %c0_12 = arith.constant 0 : index
    %c0_13 = arith.constant 0 : index
    %18 = vector.load %arg6[%c0_12, %c0_13] : memref<160x8xbf16, #tpu.memory_space<vmem>>, vector<160x8xbf16>
    %cst_14 = arith.constant dense<0.000000e+00> : vector<48x8xf32>
    %19 = tpu.matmul %17, %18, %cst_14 {dimension_numbers = #tpu.dot_dimension_numbers<[1], [0], [0], [1], [0, 0, 1, 1], [], []>} : vector<48x160xbf16>, vector<160x8xbf16>, vector<48x8xf32> -> vector<48x8xf32>
    %c0_15 = arith.constant 0 : index
    %c0_16 = arith.constant 0 : index
    %20 = vector.load %arg7[%c0_15, %c0_16] : memref<1x8xf32, #tpu.memory_space<vmem>>, vector<1x8xf32>
    %21 = vector.broadcast %20 : vector<1x8xf32> to vector<48x8xf32>
    %22 = arith.addf %19, %21 : vector<48x8xf32>
    %23 = math.tanh %22 : vector<48x8xf32>
    %c0_17 = arith.constant 0 : index
    %c0_18 = arith.constant 0 : index
    %24 = vector.load %arg8[%c0_17, %c0_18] : memref<48x8xf32, #tpu.memory_space<vmem>>, vector<48x8xf32>
    tpu.vector_store %arg8[%c0_17, %c0_18], %23 {strides = array<i32>} : memref<48x8xf32, #tpu.memory_space<vmem>>, vector<48x8xf32>,
    return
  }
  func.func @transform_0(%arg0: i32) -> (i32, i32) {
    %c0_i32 = arith.constant 0 : i32
    %c0_i32_0 = arith.constant 0 : i32
    return %arg0, %c0_i32 : i32, i32
  }
  func.func @transform_1(%arg0: i32) -> (i32, i32) {
    %c0_i32 = arith.constant 0 : i32
    %c0_i32_0 = arith.constant 0 : i32
    %c0_i32_1 = arith.constant 0 : i32
    return %c0_i32, %c0_i32_0 : i32, i32
  }
  func.func @transform_2(%arg0: i32) -> (i32, i32) {
    %c0_i32 = arith.constant 0 : i32
    %c0_i32_0 = arith.constant 0 : i32
    %c0_i32_1 = arith.constant 0 : i32
    return %c0_i32, %c0_i32_0 : i32, i32
  }
  func.func @transform_3(%arg0: i32) -> (i32, i32) {
    %c0_i32 = arith.constant 0 : i32
    %c0_i32_0 = arith.constant 0 : i32
    %c0_i32_1 = arith.constant 0 : i32
    return %c0_i32, %c0_i32_0 : i32, i32
  }
  func.func @transform_4(%arg0: i32) -> (i32, i32) {
    %c0_i32 = arith.constant 0 : i32
    %c0_i32_0 = arith.constant 0 : i32
    %c0_i32_1 = arith.constant 0 : i32
    return %c0_i32, %c0_i32_0 : i32, i32
  }
  func.func @transform_5(%arg0: i32) -> (i32, i32) {
    %c0_i32 = arith.constant 0 : i32
    %c0_i32_0 = arith.constant 0 : i32
    %c0_i32_1 = arith.constant 0 : i32
    return %c0_i32, %c0_i32_0 : i32, i32
  }
  func.func @transform_6(%arg0: i32) -> (i32, i32) {
    %c0_i32 = arith.constant 0 : i32
    %c0_i32_0 = arith.constant 0 : i32
    %c0_i32_1 = arith.constant 0 : i32
    return %c0_i32, %c0_i32_0 : i32, i32
  }
  func.func @transform_7(%arg0: i32) -> (i32, i32) {
    %c0_i32 = arith.constant 0 : i32
    %c0_i32_0 = arith.constant 0 : i32
    return %arg0, %c0_i32 : i32, i32
  }
}

</mosaic_0001>

<bundles_post_ra>
// kernel: tpu_custom_call.1
= control target key start
LH: loop header
LB: loop body
LE: loop exit
PB: predicated region body
PF: predicated region fallthrough
CT: control target
= control target key end

     0   :  { %vm56_vm0 = vcmask 261120   ;;  %vm153_vm1 = vcmask 523264   ;;  %vm376_vm2 = vcmask 64512   ;;  %s704_s1 = inlined_call_operand.vmem [shape: bf16[32,64], index: 1, kind: input, shape index: {}]   ;;  %s705_s0 = inlined_call_operand.vmem [shape: f32[48,32], index: 0, kind: input, shape index: {}]   ;;  %s706_s3 = inlined_call_operand.vmem [shape: bf16[64,160], index: 3, kind: input, shape index: {}]   ;;  %s707_s2 = inlined_call_operand.vmem [shape: f32[1,64], index: 2, kind: input, shape index: {}]   ;;  %s708_s5 = inlined_call_operand.vmem [shape: bf16[160,8], index: 5, kind: input, shape index: {}]   ;;  %s709_s6 = inlined_call_operand.vmem [shape: f32[1,8], index: 6, kind: input, shape index: {}]   ;;  %s710_s4 = inlined_call_operand.vmem [shape: f32[1,160], index: 4, kind: input, shape index: {}]   ;;  %s711_s7 = inlined_call_operand.vmem [shape: f32[48,8], index: 7, kind: output, shape index: {}]  }
   0x1   :  { %v480_v0 = vld [vmem:[%s704_s1 + $0x8] sm:$0xff]  ;;  %v479_v1 = vld [vmem:[%s704_s1] sm:$0xff]  ;;  %v29_v4 = vld [vmem:[%s705_s0 + $0x10] sm:$0xff] }
   0x2   :  { %v27_v2 = vld [vmem:[%s705_s0] sm:$0xff]  ;;  %v28_v3 = vld [vmem:[%s705_s0 + $0x8] sm:$0xff]  ;;  %72 = vmatpush.bf16.msra.mxu0 %v480_v0  ;;  %499 = vmatpush.bf16.msra.mxu1 %v480_v0  ;;  %v30_v5 = vld [vmem:[%s705_s0 + $0x18] sm:$0xff] }
   0x3   :  { %v31_v6 = vld [vmem:[%s705_s0 + $0x20] sm:$0xff]  ;;  %v424_v7 = vld [vmem:[%s706_s3 + $0x30] sm:$0xf]  ;;  %500 = vmatpush.bf16.msra.mxu2 %v480_v0  ;;  %v32_v8 = vld [vmem:[%s705_s0 + $0x28] sm:$0xff]  ;;  %v33_v11 = vpack.c.bf16 %v28_v3, %v27_v2  ;;  %v34_v12 = vpack.c.bf16 %v30_v5, %v29_v4 }
   0x4   :  { %v488_v9 = vld [vmem:[%s706_s3 + $0x34] sm:$0xf0]  ;;  %v35_v13 = vpack.c.bf16 %v32_v8, %v31_v6  ;;  %v487_v14 = vld [vmem:[%s706_s3 + $0x34] sm:$0xf]  ;;  %v426_v15 = vld [vmem:[%s706_s3 + $0x38] sm:$0xf0] }
   0x5   :  { %v425_v10 = vor.u32 %v488_v9, %v424_v7  ;;  %v429_v16 = vor.u32 %v487_v14, %v426_v15  ;;  %v416_v17 = vld [vmem:[%s706_s3 + $0x20] sm:$0xf]  ;;  %v486_v18 = vld [vmem:[%s706_s3 + $0x24] sm:$0xf0]  ;;  %v485_v19 = vld [vmem:[%s706_s3 + $0x24] sm:$0xf] }
   0x6   :  { %73 = vmatpush.bf16.msra.mxu0 %v479_v1  ;;  %501 = vmatpush.bf16.msra.mxu1 %v479_v1  ;;  %v417_v20 = vor.u32 %v486_v18, %v416_v17  ;;  %v418_v21 = vld [vmem:[%s706_s3 + $0x28] sm:$0xf0]  ;;  %v408_v23 = vld [vmem:[%s706_s3 + $0x10] sm:$0xf]  ;;  %v484_v24 = vld [vmem:[%s706_s3 + $0x14] sm:$0xf0] }
   0x7   :  { %502 = vmatpush.bf16.msra.mxu2 %v479_v1  ;;  %v421_v22 = vor.u32 %v485_v19, %v418_v21  ;;  %v409_v25 = vor.u32 %v484_v24, %v408_v23  ;;  %v483_v26 = vld [vmem:[%s706_s3 + $0x14] sm:$0xf]  ;;  %v410_v27 = vld [vmem:[%s706_s3 + $0x18] sm:$0xf0]  ;;  %v400_v29 = vld [vmem:[%s706_s3] sm:$0xf] }
   0x8   :  { %v413_v28 = vor.u32 %v483_v26, %v410_v27  ;;  %v482_v30 = vld [vmem:[%s706_s3 + $0x4] sm:$0xf0]  ;;  %v481_v31 = vld [vmem:[%s706_s3 + $0x4] sm:$0xf]  ;;  %v402_v33 = vld [vmem:[%s706_s3 + $0x8] sm:$0xf0] }
   0x9   :  { %395 = vmatmul.msk.bf16.vlgmr.msra.gmra.mxu0 %vm56_vm0, %v33_v11  ;;  %396 = vmatmul.msk.bf16.vlgmr.msra.gmra.mxu1 %vm56_vm0, %v34_v12  ;;  %v401_v32 = vor.u32 %v482_v30, %v400_v29  ;;  %v405_v34 = vor.u32 %v481_v31, %v402_v33  ;;  %v503_v36 = vld [vmem:[%s707_s2] ss:$0 sm:$0xff]  ;;  %v496_v44 = vld [vmem:[%s708_s5 + $0x38] sm:$0xff]  ;;  %v495_v45 = vld [vmem:[%s708_s5 + $0x30] sm:$0xff] }
   0xa   :  { %167 = vmatpush.bf16.msrb.mxu1 %v425_v10  ;;  %397 = vmatmul.msk.bf16.vlgmr.msra.gmra.mxu2 %vm56_vm0, %v35_v13  ;;  %v494_v49 = vld [vmem:[%s708_s5 + $0x28] sm:$0xff]  ;;  %v493_v53 = vld [vmem:[%s708_s5 + $0x20] sm:$0xff]  ;;  %v492_v61 = vld [vmem:[%s708_s5 + $0x18] sm:$0xff] }
   0xb   :  { %191 = vmatpush.bf16.msrb.mxu2 %v429_v16  ;;  %322 = vmatpush.bf16.msra.mxu3 %v496_v44  ;;  %v491_v62 = vld [vmem:[%s708_s5 + $0x10] sm:$0xff]  ;;  %v490_v63 = vld [vmem:[%s708_s5 + $0x8] sm:$0xff]  ;;  %v489_v1 = vld [vmem:[%s708_s5] sm:$0xff] }
   0xc   :  { %v498_v0 = vld [vmem:[%s708_s5 + $0x48] sm:$0xff]  ;;  %v497_v2 = vld [vmem:[%s708_s5 + $0x40] sm:$0xff] }
   0xd   :  { %352 = vmatpush.bf16.msrb.mxu0 %v498_v0  ;;  %v107_v3 = vld [vmem:[%s710_s4] sm:$0x3] }
   0xe   :  { %168 = vmatpush.bf16.msrb.mxu1 %v417_v20  ;;  %v109_v5 = vperm.slane %v107_v3, 0  ;;  %v110_v9 = vperm.slane %v107_v3, 1 }
   0xf   :  { %192 = vmatpush.bf16.msrb.mxu2 %v421_v22  ;;  %323 = vmatpush.bf16.msra.mxu3 %v495_v45 }
  0x11   :  { %353 = vmatpush.bf16.msrb.mxu0 %v497_v2 }
  0x12   :  { %169 = vmatpush.bf16.msrb.mxu1 %v409_v25 }
  0x13   :  { %193 = vmatpush.bf16.msrb.mxu2 %v413_v28  ;;  %324 = vmatpush.bf16.msra.mxu3 %v494_v49 }
  0x16   :  { %170 = vmatpush.bf16.msrb.mxu1 %v401_v32 }
  0x17   :  { %194 = vmatpush.bf16.msrb.mxu2 %v405_v34  ;;  %325 = vmatpush.bf16.msra.mxu3 %v493_v53 }
  0x1b   :  { %326 = vmatpush.bf16.msra.mxu3 %v492_v61 }
  0x1f   :  { %327 = vmatpush.bf16.msra.mxu3 %v491_v62 }
  0x23   :  { %328 = vmatpush.bf16.msra.mxu3 %v490_v63 }
  0x27   :  { %329 = vmatpush.bf16.msra.mxu3 %v489_v1 }
  0x86   :  { %v75_v35 = vpop.f32.mrf.mxu0  ;;  %v80_v39 = vpop.f32.mrf.mxu1 }
  0x87   :  { %v76_v37 = vadd.f32 %v503_v36, %v75_v35  ;;  %v81_v47 = vadd.f32 %v503_v36, %v80_v39 }
  0x89   :  { %v90_v41 = vmax.f32 %v76_v37, 0.0  ;;  %v92_v51 = vmax.f32 %v81_v47, 0.0 }
  0x8d   :  { %v85_v50 = vpop.f32.mrf.mxu2 }
  0x8e   :  { %v77_v38 = vpop.f32.mrf.mxu0  ;;  %v82_v46 = vpop.f32.mrf.mxu1  ;;  %v86_v56 = vadd.f32 %v503_v36, %v85_v50 }
  0x8f   :  { %v78_v40 = vadd.f32 %v503_v36, %v77_v38  ;;  %v83_v48 = vadd.f32 %v503_v36, %v82_v46 }
  0x90   :  { %v94_v58 = vmax.f32 %v86_v56, 0.0 }
  0x91   :  { %v91_v42 = vmax.f32 %v78_v40, 0.0  ;;  %v93_v52 = vmax.f32 %v83_v48, 0.0  ;;  %v504_v48 = vld [vmem:[%s709_s6] ss:$0 sm:$0xff] }
  0x93   :  { %v96_v43 = vpack.c.bf16 %v91_v42, %v90_v41  ;;  %v97_v54 = vpack.c.bf16 %v93_v52, %v92_v51 }
  0x95   :  { %430 = vmatmul.msk.bf16.vlgmr.msrb.gmra.mxu1 %vm153_vm1, %v96_v43  ;;  %433 = vmatmul.msk.bf16.vlgmr.msrb.gmra.mxu2 %vm153_vm1, %v96_v43  ;;  %v87_v55 = vpop.f32.mrf.mxu2 }
  0x96   :  { %v88_v57 = vadd.f32 %v503_v36, %v87_v55 }
  0x98   :  { %v95_v59 = vmax.f32 %v88_v57, 0.0 }
  0x9a   :  { %v98_v60 = vpack.c.bf16 %v95_v59, %v94_v58 }
  0xa5   :  { %431 = vmatmul.msk.bf16.gmra.mxu1 %vm153_vm1, %v97_v54  ;;  %434 = vmatmul.msk.bf16.gmra.mxu2 %vm153_vm1, %v97_v54 }
  0xb5   :  { %432 = vmatmul.msk.bf16.gmra.mxu1 %vm153_vm1, %v98_v60  ;;  %435 = vmatmul.msk.bf16.gmra.mxu2 %vm153_vm1, %v98_v60 }
 0x112   :  { %v172_v4 = vpop.f32.mrf.mxu1 }
 0x113   :  { %v173_v7 = vadd.f32 %v172_v4, %v109_v5 }
 0x115   :  { %v211_v11 = vmax.f32 %v173_v7, 0.0 }
 0x118   :  { %v196_v6 = vpop.f32.mrf.mxu2 }
 0x119   :  { %v197_v13 = vadd.f32 %v196_v6, %v110_v9 }
 0x11a   :  { %v174_v8 = vpop.f32.mrf.mxu1 }
 0x11b   :  { %v175_v10 = vadd.f32 %v174_v8, %v109_v5  ;;  %v212_v18 = vmax.f32 %v197_v13, 0.0 }
 0x11d   :  { %v213_v12 = vmax.f32 %v175_v10, 0.0 }
 0x11f   :  { %v223_v14 = vpack.c.bf16 %v213_v12, %v211_v11 }
 0x120   :  { %v198_v15 = vpop.f32.mrf.mxu2 }
 0x121   :  { %v199_v16 = vadd.f32 %v198_v15, %v110_v9  ;;  %330 = vmatmul.bf16.vlgmr.msra.gmra.mxu3 %v223_v14 }
 0x122   :  { %v177_v17 = vpop.f32.mrf.mxu1 }
 0x123   :  { %v214_v19 = vmax.f32 %v199_v16, 0.0  ;;  %v178_v22 = vadd.f32 %v177_v17, %v109_v5 }
 0x125   :  { %v224_v20 = vpack.c.bf16 %v214_v19, %v212_v18  ;;  %v215_v25 = vmax.f32 %v178_v22, 0.0 }
 0x127   :  { %476 = vmatmul.msk.bf16.vlgmr.msrb.gmra.mxu0 %vm56_vm0, %v224_v20 }
 0x128   :  { %v201_v21 = vpop.f32.mrf.mxu2 }
 0x129   :  { %v202_v27 = vadd.f32 %v201_v21, %v110_v9 }
 0x12a   :  { %v179_v23 = vpop.f32.mrf.mxu1 }
 0x12b   :  { %v180_v24 = vadd.f32 %v179_v23, %v109_v5  ;;  %v216_v32 = vmax.f32 %v202_v27, 0.0 }
 0x12d   :  { %v217_v26 = vmax.f32 %v180_v24, 0.0 }
 0x12f   :  { %v225_v28 = vpack.c.bf16 %v217_v26, %v215_v25 }
 0x130   :  { %v203_v29 = vpop.f32.mrf.mxu2 }
 0x131   :  { %v204_v30 = vadd.f32 %v203_v29, %v110_v9  ;;  %335 = vmatmul.bf16.gmra.mxu3 %v225_v28 }
 0x132   :  { %v182_v31 = vpop.f32.mrf.mxu1 }
 0x133   :  { %v218_v33 = vmax.f32 %v204_v30, 0.0  ;;  %v183_v36 = vadd.f32 %v182_v31, %v109_v5 }
 0x135   :  { %v226_v34 = vpack.c.bf16 %v218_v33, %v216_v32  ;;  %v219_v39 = vmax.f32 %v183_v36, 0.0 }
 0x137   :  { %477 = vmatmul.msk.bf16.gmra.mxu0 %vm56_vm0, %v226_v34 }
 0x138   :  { %v206_v35 = vpop.f32.mrf.mxu2 }
 0x139   :  { %v207_v41 = vadd.f32 %v206_v35, %v110_v9 }
 0x13a   :  { %v184_v37 = vpop.f32.mrf.mxu1 }
 0x13b   :  { %v185_v38 = vadd.f32 %v184_v37, %v109_v5  ;;  %v220_v45 = vmax.f32 %v207_v41, 0.0 }
 0x13d   :  { %v221_v40 = vmax.f32 %v185_v38, 0.0 }
 0x13f   :  { %v227_v42 = vpack.c.bf16 %v221_v40, %v219_v39 }
 0x140   :  { %v208_v43 = vpop.f32.mrf.mxu2 }
 0x141   :  { %v209_v44 = vadd.f32 %v208_v43, %v110_v9  ;;  %340 = vmatmul.bf16.gmra.mxu3 %v227_v42 }
 0x143   :  { %v222_v46 = vmax.f32 %v209_v44, 0.0 }
 0x145   :  { %v228_v47 = vpack.c.bf16 %v222_v46, %v220_v45 }
 0x147   :  { %478 = vmatmul.msk.bf16.gmra.mxu0 %vm56_vm0, %v228_v47 }
 0x1a4   :  { %v331_v49 = vpop.f32.mrf.mxu3  ;;  %v355_v50 = vpop.f32.mrf.mxu0 }
 0x1a5   :  { %v332_v51 = vadd.f32 %v504_v48, %v331_v49 }
 0x1a7   :  { %v356_v52 = vadd.f32 %v355_v50, %v332_v51 }
 0x1a9   :  { %505 = vtanh.f32 %v356_v52 }
 0x1ac   :  { %v333_v53 = vpop.f32.mrf.mxu3  ;;  %v357_v54 = vpop.f32.mrf.mxu0 }
 0x1ad   :  { %v334_v55 = vadd.f32 %v504_v48, %v333_v53 }
 0x1af   :  { %v506_v56 = vpop.eup %505  ;;  %v358_v57 = vadd.f32 %v357_v54, %v334_v55 }
 0x1b0   :  { %377 = vst.msk [vmem:[%s711_s7] sm:$0xff] %vm376_vm2, %v506_v56 }
 0x1b1   :  { %507 = vtanh.f32 %v358_v57 }
 0x1b4   :  { %v336_v58 = vpop.f32.mrf.mxu3  ;;  %v360_v59 = vpop.f32.mrf.mxu0 }
 0x1b5   :  { %v337_v60 = vadd.f32 %v504_v48, %v336_v58 }
 0x1b7   :  { %v508_v61 = vpop.eup %507  ;;  %v361_v62 = vadd.f32 %v360_v59, %v337_v60 }
 0x1b8   :  { %378 = vst.msk [vmem:[%s711_s7 + $0x8] sm:$0xff] %vm376_vm2, %v508_v61 }
 0x1b9   :  { %509 = vtanh.f32 %v361_v62 }
 0x1bc   :  { %v338_v63 = vpop.f32.mrf.mxu3  ;;  %v362_v0 = vpop.f32.mrf.mxu0 }
 0x1bd   :  { %v339_v1 = vadd.f32 %v504_v48, %v338_v63 }
 0x1bf   :  { %v510_v2 = vpop.eup %509  ;;  %v363_v3 = vadd.f32 %v362_v0, %v339_v1 }
 0x1c0   :  { %379 = vst.msk [vmem:[%s711_s7 + $0x10] sm:$0xff] %vm376_vm2, %v510_v2 }
 0x1c1   :  { %511 = vtanh.f32 %v363_v3 }
 0x1c4   :  { %v341_v4 = vpop.f32.mrf.mxu3  ;;  %v365_v5 = vpop.f32.mrf.mxu0 }
 0x1c5   :  { %v342_v6 = vadd.f32 %v504_v48, %v341_v4 }
 0x1c7   :  { %v512_v7 = vpop.eup %511  ;;  %v366_v8 = vadd.f32 %v365_v5, %v342_v6 }
 0x1c8   :  { %380 = vst.msk [vmem:[%s711_s7 + $0x18] sm:$0xff] %vm376_vm2, %v512_v7 }
 0x1c9   :  { %513 = vtanh.f32 %v366_v8 }
 0x1cc   :  { %v343_v9 = vpop.f32.mrf.mxu3  ;;  %v367_v11 = vpop.f32.mrf.mxu0 }
 0x1cd   :  { %v344_v10 = vadd.f32 %v504_v48, %v343_v9 }
 0x1cf   :  { %v514_v12 = vpop.eup %513  ;;  %v368_v13 = vadd.f32 %v367_v11, %v344_v10 }
 0x1d0   :  { %381 = vst.msk [vmem:[%s711_s7 + $0x20] sm:$0xff] %vm376_vm2, %v514_v12 }
 0x1d1   :  { %515 = vtanh.f32 %v368_v13 }
 0x1d7   :  { %v516_v14 = vpop.eup %515 }
 0x1d8   :  { %382 = vst.msk [vmem:[%s711_s7 + $0x28] sm:$0xff] %vm376_vm2, %v516_v14 }

</bundles_post_ra>
